<compile_context>
chip_gen: v7x
topology: tpu7x:2x2x1
jax: 0.10.0
libtpu: 0.0.40
codegen_flags: <defaults>
</compile_context>

<pallas_src>
import functools

import jax
import jax.numpy as jnp
from jax.experimental import pallas as pl
from jax.experimental.pallas import tpu as pltpu


def _gating_kernel(x_ref, wt_ref, b_ref, o_ref):
    # x_ref: (tm, D)   wt_ref: (D, D) = W.T (resident)   b_ref: (1, D) f32   o_ref: (tm, D)
    x = x_ref[...]

    # MXU matmul: operands in the weight's dtype (bf16 by default), f32 acc.
    logits = jnp.dot(x.astype(wt_ref.dtype), wt_ref[...],
                     preferred_element_type=jnp.float32)
    logits = logits + b_ref[...]                     # bias kept in f32

    # sigmoid as EUP-only ops (exp + approx reciprocal): hides under MXU/DMA.
    coeff = pl.reciprocal(1.0 + jnp.exp(-logits), approx=True)

    if x.dtype == jnp.bfloat16:
        # bf16 VALU epilogue (v6e/v7x): no f32 copy of the x tile.
        o_ref[...] = (x * coeff.astype(jnp.bfloat16)).astype(o_ref.dtype)
    else:
        o_ref[...] = (x.astype(jnp.float32) * coeff).astype(o_ref.dtype)


def _round_up(n, m):
    return ((n + m - 1) // m) * m


def _choose_tm(M, D, x_itemsize, w_itemsize):
    """Row-tile size against an explicit VMEM budget (safe on v7x's 64 MiB/TC)."""
    if M <= 8:
        return max(int(M), 1)                      # block == full row extent (legal)
    target = 48 * 1024 * 1024                      # headroom under v7x 64 MiB/TC
    resident = D * D * w_itemsize + D * 4          # single-buffered W.T + f32 bias
    per_row = 4 * D * x_itemsize + 3 * D * 4       # 2x-buffered x/out + f32 temps
    avail = max(target - resident, 1 << 20)
    max_tm = max(8, avail // per_row)
    tm = min(512, max_tm, M)
    # Keep >= 2 grid steps so dimension_semantics=("parallel",) can shard the
    # row axis across v7x's two TensorCores.
    tm = min(tm, _round_up((M + 1) // 2, 8))
    if tm >= 256:
        tm = (tm // 256) * 256                     # match v6e/v7x 256x256 MXU
    else:
        tm = max(8, (tm // 8) * 8)                 # sublane alignment
    return int(tm)


def prepare_gating_params(weight, bias, mxu_dtype=jnp.bfloat16):
    """One-time prep: W.T in the MXU dtype + f32 bias row.  Cache across calls
    when the weight is static (avoids a per-call HBM transpose pass)."""
    w_t = jnp.asarray(weight).T.astype(mxu_dtype)
    b2d = jnp.asarray(bias).astype(jnp.float32).reshape(1, -1)
    return w_t, b2d


@functools.partial(jax.jit, static_argnames=("tm",))
def _gating_call(x2d, w_t, b2d, *, tm):
    M, D = x2d.shape
    grid = (pl.cdiv(M, tm),)

    x_itemsize = jnp.dtype(x2d.dtype).itemsize
    w_itemsize = jnp.dtype(w_t.dtype).itemsize
    needed = (D * D * w_itemsize + D * 4           # resident W.T + bias (1x buffered)
              + 4 * tm * D * x_itemsize            # x + out, double-buffered
              + 3 * tm * D * 4)                    # f32 logits/coeff/x temporaries
    vmem_limit = int(min(56 << 20, max(int(needed * 1.25), 16 << 20)))

    return pl.pallas_call(
        _gating_kernel,
        out_shape=jax.ShapeDtypeStruct((M, D), x2d.dtype),
        grid_spec=pltpu.PrefetchScalarGridSpec(
            num_scalar_prefetch=0,
            grid=grid,
            in_specs=[
                # Streamed x row-tiles (double-buffered by the pipeline).
                pl.BlockSpec((tm, D), lambda i: (i, 0)),
                # Resident W.T: constant index_map -> single-buffer it.
                pl.BlockSpec((D, D), lambda i: (0, 0),
                             pipeline_mode=pl.Buffered(1)),
                # Resident bias row (f32), single-buffered.
                pl.BlockSpec((1, D), lambda i: (0, 0),
                             pipeline_mode=pl.Buffered(1)),
            ],
            out_specs=pl.BlockSpec((tm, D), lambda i: (i, 0)),
        ),
        compiler_params=pltpu.CompilerParams(
            dimension_semantics=("parallel",),
            vmem_limit_bytes=vmem_limit,
        ),
    )(x2d, w_t, b2d)


def gating(x, weight, bias, *, tm=None, mxu_dtype=jnp.bfloat16):
    """x: [..., dim], weight: [dim, dim] (nn.Linear layout), bias: [dim] -> [..., dim].

    mxu_dtype=bf16 feeds the MXU native bf16 operands (fast path, tiny precision
    delta vs f32); pass mxu_dtype=None to keep the matmul in x's dtype.
    """
    orig_shape = x.shape
    dim = orig_shape[-1]
    x2d = x.reshape(-1, dim)
    M = x2d.shape[0]

    if mxu_dtype is None:
        mxu_dtype = x.dtype
    w_t, b2d = prepare_gating_params(weight, bias, mxu_dtype)

    if tm is None:
        tm = _choose_tm(M, dim,
                        jnp.dtype(x.dtype).itemsize,
                        jnp.dtype(w_t.dtype).itemsize)

    out = _gating_call(x2d, w_t, b2d, tm=tm)
    return out.reshape(orig_shape)


if __name__ == "__main__":
    key = jax.random.PRNGKey(0)
    batch, seq, dim = 2, 8, 32

    kx, kw, kb = jax.random.split(key, 3)
    x = jax.random.normal(kx, (batch, seq, dim), dtype=jnp.float32)
    # Deterministic params (mimicking nn.Linear's uniform(-1/sqrt(dim), 1/sqrt(dim))).
    bound = 1.0 / jnp.sqrt(dim)
    weight = jax.random.uniform(kw, (dim, dim), minval=-bound, maxval=bound,
                                dtype=jnp.float32)
    bias = jax.random.uniform(kb, (dim,), minval=-bound, maxval=bound,
                              dtype=jnp.float32)

    out = jax.block_until_ready(gating(x, weight, bias))

    # Reference (matches nn.Linear: x @ W.T + b) in pure f32 JAX.
    ref = x * jax.nn.sigmoid(jnp.einsum("bsd,ed->bse", x, weight) + bias)
    assert out.shape == x.shape
    # Tolerance relaxed vs the f32 reference: bf16 MXU operands + EUP approx
    # reciprocal in the kernel (documented precision trade-off).
    assert jnp.allclose(out, ref, atol=5e-2, rtol=5e-2), "mismatch vs reference"

    print("KERNEL_OK")
</pallas_src>

<mosaic_0001>
module attributes {stable_mosaic.version = 11 : i64} {
  func.func @_gating_kernel(%arg0: i32, %arg1: memref<8x32xf32, #tpu.memory_space<vmem>>, %arg2: memref<32x32xbf16, #tpu.memory_space<vmem>>, %arg3: memref<1x32xf32, #tpu.memory_space<vmem>>, %arg4: memref<8x32xf32, #tpu.memory_space<vmem>>) attributes {dimension_semantics = [#tpu.dimension_semantics<parallel>], iteration_bounds = array<i64: 2>, scalar_prefetch = 0 : i64, scratch_operands = 0 : i64, tpu.core_type = #tpu.core_type<tc>, window_params = [{transform_indices = @transform_0, window_bounds = array<i64: 8, 32>}, {pipeline_mode = #tpu.pipeline_mode<synchronous>, transform_indices = @transform_1, window_bounds = array<i64: 32, 32>}, {pipeline_mode = #tpu.pipeline_mode<synchronous>, transform_indices = @transform_2, window_bounds = array<i64: 1, 32>}, {transform_indices = @transform_3, window_bounds = array<i64: 8, 32>}]} {
    %c0 = arith.constant 0 : index
    %c0_0 = arith.constant 0 : index
    %0 = vector.load %arg1[%c0, %c0_0] : memref<8x32xf32, #tpu.memory_space<vmem>>, vector<8x32xf32>
    %1 = arith.truncf %0 : vector<8x32xf32> to vector<8x32xbf16>
    %c0_1 = arith.constant 0 : index
    %c0_2 = arith.constant 0 : index
    %2 = vector.load %arg2[%c0_1, %c0_2] : memref<32x32xbf16, #tpu.memory_space<vmem>>, vector<32x32xbf16>
    %cst = arith.constant dense<0.000000e+00> : vector<8x32xf32>
    %3 = tpu.matmul %1, %2, %cst {dimension_numbers = #tpu.dot_dimension_numbers<[1], [0], [0], [1], [0, 0, 1, 1], [], []>} : vector<8x32xbf16>, vector<32x32xbf16>, vector<8x32xf32> -> vector<8x32xf32>
    %c0_3 = arith.constant 0 : index
    %c0_4 = arith.constant 0 : index
    %4 = vector.load %arg3[%c0_3, %c0_4] : memref<1x32xf32, #tpu.memory_space<vmem>>, vector<1x32xf32>
    %5 = vector.broadcast %4 : vector<1x32xf32> to vector<8x32xf32>
    %6 = arith.addf %3, %5 : vector<8x32xf32>
    %cst_5 = arith.constant 0.000000e+00 : f32
    %7 = vector.broadcast %cst_5 : f32 to vector<8x32xf32>
    %8 = arith.subf %7, %6 : vector<8x32xf32>
    %9 = math.exp %8 : vector<8x32xf32>
    %cst_6 = arith.constant 1.000000e+00 : f32
    %10 = vector.broadcast %cst_6 : f32 to vector<8x32xf32>
    %11 = arith.addf %10, %9 : vector<8x32xf32>
    %12 = tpu.reciprocal %11 {approx = true} : vector<8x32xf32> -> vector<8x32xf32>
    %13 = arith.mulf %0, %12 : vector<8x32xf32>
    %c0_7 = arith.constant 0 : index
    %c0_8 = arith.constant 0 : index
    %14 = vector.load %arg4[%c0_7, %c0_8] : memref<8x32xf32, #tpu.memory_space<vmem>>, vector<8x32xf32>
    tpu.vector_store %arg4[%c0_7, %c0_8], %13 {strides = array<i32>} : memref<8x32xf32, #tpu.memory_space<vmem>>, vector<8x32xf32>,
    return
  }
  func.func @transform_0(%arg0: i32) -> (i32, i32) {
    %c0_i32 = arith.constant 0 : i32
    %c0_i32_0 = arith.constant 0 : i32
    return %arg0, %c0_i32 : i32, i32
  }
  func.func @transform_1(%arg0: i32) -> (i32, i32) {
    %c0_i32 = arith.constant 0 : i32
    %c0_i32_0 = arith.constant 0 : i32
    %c0_i32_1 = arith.constant 0 : i32
    return %c0_i32, %c0_i32_0 : i32, i32
  }
  func.func @transform_2(%arg0: i32) -> (i32, i32) {
    %c0_i32 = arith.constant 0 : i32
    %c0_i32_0 = arith.constant 0 : i32
    %c0_i32_1 = arith.constant 0 : i32
    return %c0_i32, %c0_i32_0 : i32, i32
  }
  func.func @transform_3(%arg0: i32) -> (i32, i32) {
    %c0_i32 = arith.constant 0 : i32
    %c0_i32_0 = arith.constant 0 : i32
    return %arg0, %c0_i32 : i32, i32
  }
}

</mosaic_0001>

<bundles_post_ra>
// kernel: _gating_call.1
= control target key start
LH: loop header
LB: loop body
LE: loop exit
PB: predicated region body
PF: predicated region fallthrough
CT: control target
= control target key end

     0   :  { %8 = vsyncpa [#allocation3], 0  ;;  %s830_s0 = inlined_call_operand.hbm [shape: f32[16,32], index: 0, kind: input, shape index: {}]   ;;  %s831_s1 = inlined_call_operand.hbm [shape: bf16[32,32], index: 1, kind: input, shape index: {}]   ;;  %s832_s2 = inlined_call_operand.vmem [shape: f32[1,32], index: 2, kind: input, shape index: {}]   ;;  %s833_s3 = inlined_call_operand.hbm [shape: f32[16,32], index: 3, kind: output, shape index: {}]  }
   0x1   :  { %10 = vsyncpa [#allocation3 + $0x1], 0 }
   0x2   :  { %11 = vsyncpa [#allocation6], 0 }
   0x3   :  { %12 = vsyncpa [#allocation4], 0 }
   0x4   :  { %14 = vsyncpa [#allocation4 + $0x1], 0  ;;  %s625_s12 = smov 0   ;;  %s627_s13 = smov 0  }
   0x5   :  { %s629_s14 = smov 0   ;;  %s631_s15 = smov 0  }
   0x6 LB: > { %s646_s16 = sadd.s32 4294967295, %s596_s15   ;;  %s372_s17 = sadd.s32 4294967294, %s596_s15   ;;  %s596_s15 = sphi %s631_s15, %s853_s15   ;;  %s592_s14 = sphi %s629_s14, %s852_s14   ;;  %s588_s13 = sphi %s627_s13, %s851_s13   ;;  %s584_s12 = sphi %s625_s12, %s850_s12  }
   0x7   : > { %p40_p0 = scmp.ne.s32.totalorder %s588_s13, %s584_s12  ;;  %p834_p1 = scmp.eq.s32.totalorder %s646_s16, 0 }
   0x8   : > { %p112_p3 = scmp.eq.s32.totalorder %s372_s17, 1  ;;  %p373_p5 = scmp.ge.s32.totalorder %s596_s15, 1 }
   0x9   : > { %p655_p4 = por %p834_p1, %p40_p0  ;;  %p119_p7 = scmp.lt.s32.totalorder %s596_s15, 3 }
   0xa   : > { %p660_p6 = por %p112_p3, %p40_p0  ;;  %s598_s21 = smov [#allocation5]  }
   0xb   : > { %s837_s18 = scalar_select %p655_p4, 1, 0 }
   0xc   : > { %s838_s19 = scalar_select %p660_p6, 1, 0 }
   0xd   : > { %p665_p8 = pnand %p373_p5, %p119_p7  ;;  %s131_s22 = sshll.u32 %s598_s21, 4  ;;  %s669_s22 = int_to_ptr.vmem [resolvable:$true] %s131_s22 }
   0xe   : > { %s681_s24 = sadd.s32 1, %s596_s15   ;;  %s27_s25 = sadd.s32 1, %s592_s14 }
   0xf   : > { %s839_s20 = scalar_select %p665_p8, 1, 0 }
  0x10   : > { %p409_p9 = pneg %p665_p8  ;;  %s24_s26 = ssub.s32 %s596_s15, %s681_s24 }
  0x11   : > { %s468_s29 = scalar_lea.hbm %s831_s1, 256 }
  0x12   : > { %p676_p11 = pnand %p409_p9, %p834_p1  ;;  %p469_p12 = scmp.ne.s32.totalorder %s831_s1, %s468_s29 }
  0x13   : > { %p475_p5 = scmp.lt.u32.totalorder %s468_s29, %s831_s1 }
  0x14   : > { %p470_p13 = pneg %p676_p11 }
  0x16   : > { %p471_p0 = pnand %p470_p13, %p469_p12 }
  0x18   : > { %p472_p3 = pneg %p471_p0 }
  0x1a   : > { %p477_p7 = pnand %p475_p5, %p472_p3 }
  0x1c   : > { %480 = shalt.err (!%p477_p7)
}
  0x1d   : > { %s481_s7 = scalar_lea.vmem %s669_s22, 256  ;;  %p489_p2 = scmp.lt.s32.totalorder %s669_s22, %s669_s22 }
  0x1e   : > { %p482_p9 = scmp.ne.s32.totalorder %s669_s22, %s481_s7  ;;  %p490_p6 = scmp.lt.s32.totalorder %s481_s7, %s481_s7 }
  0x20   : > { %p484_p10 = pnand %p482_p9, %p470_p13  ;;  %p491_p4 = por %p490_p6, %p489_p2 }
  0x22   : > { %p485_p1 = pneg %p484_p10 }
  0x24   : > { %p492_p8 = pnand %p491_p4, %p485_p1 }
  0x26   : > { %495 = shalt.err (!%p492_p8)
}
  0x27   : > { %s599_s8 = smov 64   ;;  %s600_s9 = smov 4  }
  0x28   : > { %412 = dma.hbm_to_vmem [thread:$0]  (!%p676_p11), %s831_s1, 256, %s669_s22, [#allocation6], %s599_s8, %s599_s8, %s600_s9  }
  0x29   : > { %p25_p2 = scmp.eq.s32.totalorder %s24_s26, 0  ;;  %p34_p1 = scmp.ne.s32.totalorder %s592_s14, %s588_s13 }
  0x2a   : > { %p35_p4 = scmp.eq.s32.totalorder %s596_s15, 0  ;;  %p422_p6 = scmp.lt.s32.totalorder %s596_s15, 2 }
  0x2b   : > { %s712_s17 = scalar_select %p25_p2, %s592_s14, %s27_s25  }
  0x2c   : > { %p36_p8 = por %p35_p4, %p34_p1  ;;  %p841_p10 = scmp.eq.s32.totalorder %s646_s16, 1 }
  0x2d   : > { %s148_s27 = sand.u32 1, %s592_s14   ;;  %s377_s28 = sshll.u32 %s596_s15, 7 }
  0x2e   : > { %p716_p12 = por %p841_p10, %p34_p1  ;;  %s376_s29 = sshll.u32 %s148_s27, 3 }
  0x2f   : > { %s725_s4 = scalar_lea.hbm %s830_s0, %s377_s28  ;;  %s152_s22 = scalar_lea.vmem [#allocation2], %s376_s29 }
  0x30   : > { %s159_s25 = sshll.u32 %s152_s22, 4  ;;  %p727_p11 = pnand %p422_p6, %p36_p8  ;;  %s731_s25 = int_to_ptr.vmem [resolvable:$true] %s159_s25 }
  0x31   : > { %s149_s5 = scalar_lea.sflag [#allocation3], %s148_s27  ;;  %s496_s6 = scalar_lea.hbm %s725_s4, 128 }
  0x32   : > { %p497_p13 = scmp.ne.s32.totalorder %s725_s4, %s496_s6  ;;  %p498_p0 = pneg %p727_p11 }
  0x33   : > { %s501_s9 = scalar_lea.hbm %s830_s0, 256  ;;  %p502_p7 = scmp.lt.u32.totalorder %s725_s4, %s830_s0 }
  0x34   : > { %p499_p3 = pnand %p498_p0, %p497_p13  ;;  %p503_p9 = scmp.lt.u32.totalorder %s501_s9, %s496_s6 }
  0x35   : > { %p505_p1 = scmp.lt.u32.totalorder %s496_s6, %s725_s4 }
  0x36   : > { %p500_p5 = pneg %p499_p3  ;;  %p504_p2 = por %p503_p9, %p502_p7 }
  0x38   : > { %p506_p4 = por %p505_p1, %p504_p2 }
  0x3a   : > { %p507_p6 = pnand %p506_p4, %p500_p5 }
  0x3c   : > { %510 = shalt.err (!%p507_p6)
}
  0x3d   : > { %s511_s27 = scalar_lea.vmem %s731_s25, 128  ;;  %s601_s28 = smov [#allocation2]  }
  0x3e   : > { %p512_p8 = scmp.ne.s32.totalorder %s731_s25, %s511_s27  ;;  %s516_s29 = sshll.u32 %s601_s28, 4  ;;  %s517_s29 = int_to_ptr.vmem [resolvable:$false] %s516_s29 }
  0x3f   : > { %s518_s23 = scalar_lea.vmem %s517_s29, 256  ;;  %p519_p3 = scmp.lt.s32.totalorder %s731_s25, %s517_s29 }
  0x40   : > { %p514_p10 = pnand %p512_p8, %p498_p0  ;;  %p520_p7 = scmp.lt.s32.totalorder %s518_s23, %s511_s27 }
  0x42   : > { %p515_p13 = pneg %p514_p10  ;;  %p521_p9 = por %p520_p7, %p519_p3 }
  0x44   : > { %p522_p2 = pnand %p521_p9, %p515_p13 }
  0x46   : > { %525 = shalt.err (!%p522_p2)
}
  0x47   : > { %416 = dma.hbm_to_vmem [thread:$0]  (!%p727_p11), %s725_s4, 128, %s731_s25, %s149_s5  }
  0x48   : > { %p844_p5 = scmp.ne.s32.totalorder %s839_s20, 0 }
  0x49   : > { %s761_s30 = sand.u32 (!%p844_p5), 1, %s588_s13   ;;  %p845_p0 = scmp.ne.s32.totalorder (!%p844_p5), %s837_s18, 0 }
  0x4a   : > { %168 = sbr.rel (%p844_p5) target bundleno = 352 (0x160), region = 32  ;;  %s379_s22 = sshll.u32 (!%p844_p5), %s761_s30, 3 }
  0x4b   : > { %s171_s6 = scalar_lea.sflag (!%p844_p5), [#allocation3], %s761_s30  ;;  %s174_s7 = scalar_lea.vmem (!%p844_p5), [#allocation2], %s379_s22 }
  0x51   : > { %571 = dma.done.wait (%p845_p0), %s171_s6, 128  }
  0x52   : > { %573 = vsyncadd (%p845_p0), %s171_s6, 4294967168  ;;  %p846_p11 = scmp.eq.s32.totalorder %s646_s16, 0 }
  0x54   : > { %575 = dma.done.wait (%p846_p11), [#allocation6], 256   ;;  %p847_p1 = pmov %p846_p11 }
  0x55   : > { %v602_v0 = vmov 0.0   ;;  %vm603_vm0 = vmmov 0   ;;  %v462_v1 = vld [vmem:[#allocation5] sm:$0xff]   ;;  %v463_v2 = vld [vmem:[#allocation5 + $0x8] sm:$0xff]   ;;  %v202_v3 = vld [vmem:[%s174_s7] sm:$0xff]  ;;  %vm227_vm1 = vcmask 261120  }
  0x56   : > { %577 = vsyncadd (%p847_p1), [#allocation6], 4294967040  ;;  %393 = vmatprep.subr.bf16.mxu0 %v602_v0  ;;  %397 = vmatprep.mubr.msk.bf16.mxu0 %vm603_vm0, %v602_v0  ;;  %v203_v4 = vpack.c.bf16 %v202_v3, %v202_v3  ;;  %v382_v5 = vld [vmem:[%s832_s2] ss:$0 sm:$0xff]  ;;  %s387_s4 = sshll.u32 %s646_s16, 7  ;;  %s200_s25 = scalar_lea.vmem [#allocation7], %s379_s22 }
  0x57   : > { %394 = vmatpush3.bf16.msra.mxu0 %v462_v1  ;;  %s292_s26 = sshll.u32 %s200_s25, 4  ;;  %s785_s9 = scalar_lea.hbm %s833_s3, %s387_s4  ;;  %s787_s26 = int_to_ptr.vmem [resolvable:$true] %s292_s26 }
  0x58   : > { %395 = vmatprep.subr.bf16.mxu0 %v602_v0  ;;  %s279_s10 = scalar_lea.sflag [#allocation4], %s761_s30  ;;  %s526_s11 = scalar_lea.vmem %s787_s26, 128 }
  0x59   : > { %p527_p4 = scmp.ne.s32.totalorder %s787_s26, %s526_s11  ;;  %s604_s16 = smov [#allocation7]  }
  0x5a   : > { %s530_s27 = sshll.u32 %s604_s16, 4  ;;  %s531_s27 = int_to_ptr.vmem [resolvable:$false] %s530_s27 }
  0x5b   : > { %396 = vmatpush3.bf16.msra.mxu0 %v463_v2  ;;  %p528_p6 = pnand %p527_p4, %p716_p12  ;;  %s532_s28 = scalar_lea.vmem %s531_s27, 256 }
  0x5c   : > { %p533_p10 = scmp.lt.s32.totalorder %s787_s26, %s531_s27  ;;  %p534_p13 = scmp.lt.s32.totalorder %s532_s28, %s526_s11 }
  0x5d   : > { %p529_p8 = pneg %p528_p6 }
  0x5e   : > { %398 = vmatmul.mubr.msk.bf16.vlgmr.msra.gmra.mrb[0].mxu0 %vm227_vm1, %v203_v4  ;;  %p535_p3 = por %p534_p13, %p533_p10 }
  0x60   : > { %p536_p7 = pnand %p535_p3, %p529_p8 }
 0x131   : > { %v265_v6 = vpop.f32.mrb[0].mxu0 }
 0x132   : > { %v266_v7 = vadd.f32 %v382_v5, %v265_v6  ;;  %v399_v8 = vpop.f32.mrb[1].mxu0 }
 0x133   : > { %v268_v9 = vpop.f32.mrb[2].mxu0 }
 0x134   : > { %v271_v10 = vsub.f32 0.0, %v266_v7  ;;  %v400_v11 = vpop.f32.mrb[3].mxu0 }
 0x136   : > { %v272_v12 = vmul.f32 1.442695, %v271_v10 }
 0x138   : > { %464 = vpow2.f32 %v272_v12 }
 0x142   : > { %v465_v13 = vpop.eup %464 }
 0x143   : > { %v274_v14 = vadd.f32 1.0, %v465_v13 }
 0x145   : > { %466 = vrcp.f32 %v274_v14 }
 0x14f   : > { %v467_v15 = vpop.eup %466 }
 0x150   : > { %v276_v16 = vmul.f32 %v467_v15, %v202_v3 }
 0x152   : > { %277 = vst.msk [vmem:[%s200_s25] sm:$0xff] %vm227_vm1, %v276_v16 }
 0x153   : > { %539 = shalt.err (!%p536_p7)
}
 0x154   : > { %s540_s29 = scalar_lea.hbm %s785_s9, 128  ;;  %s544_s22 = scalar_lea.hbm %s833_s3, 256 }
 0x155   : > { %p541_p9 = scmp.ne.s32.totalorder %s785_s9, %s540_s29  ;;  %p545_p0 = scmp.lt.u32.totalorder %s785_s9, %s833_s3 }
 0x156   : > { %p546_p11 = scmp.lt.u32.totalorder %s544_s22, %s540_s29  ;;  %p548_p4 = scmp.lt.u32.totalorder %s540_s29, %s785_s9 }
 0x157   : > { %p542_p2 = pnand %p541_p9, %p716_p12 }
 0x158   : > { %p547_p1 = por %p546_p11, %p545_p0 }
 0x159   : > { %p543_p5 = pneg %p542_p2 }
 0x15a   : > { %p549_p6 = por %p548_p4, %p547_p1 }
 0x15c   : > { %p550_p8 = pnand %p549_p6, %p543_p5 }
 0x15e   : > { %553 = shalt.err (!%p550_p8)
}
 0x15f   : > { %407 = dma.vmem_to_hbm [thread:$0]  (%p716_p12), %s787_s26, 128, %s785_s9, %s279_s10  }
 0x160 PF: > { %s304_s18 = sand.u32 1, %s584_s12   ;;  %p848_p10 = scmp.ne.s32.totalorder %s838_s19, 0 }
 0x161   : > { %p849_p13 = scmp.ge.s32.totalorder %s596_s15, 2  ;;  %s305_s20 = scalar_lea.sflag [#allocation4], %s304_s18 }
 0x163   : > { %p418_p3 = pnand %p849_p13, %p848_p10 }
 0x165   : > { %579 = dma.done.wait (!%p418_p3), %s305_s20, 128  }
 0x166   : > { %581 = vsyncadd (!%p418_p3), %s305_s20, 4294967168  ;;  %p17_p7 = scmp.ge.s32.totalorder %s681_s24, 4   ;;  %s850_s12 = smov %s588_s13 }
 0x167   : > { %s851_s13 = smov %s592_s14  ;;  %s852_s14 = smov %s712_s17 }
 0x168   : > { %s853_s15 = smov %s681_s24  ;;  %19 = sbr.rel (!%p17_p7) target bundleno = 6 (0x6), region = 81 }
 0x16f   :  { %310 = vsyncpa [#allocation3], 1 }
 0x170   :  { %312 = vsyncpa [#allocation3 + $0x1], 1 }
 0x171   :  { %313 = vsyncpa [#allocation6], 1 }
 0x172   :  { %314 = vsyncpa [#allocation4], 1 }
 0x173   :  { %316 = vsyncpa [#allocation4 + $0x1], 1 }

</bundles_post_ra>
